<compile_context>
chip_gen: v5e
topology: v5e:2x2
jax: 0.10.0
libtpu: 0.0.40
codegen_flags: <defaults>
</compile_context>

<pallas_src>
import jax
import jax.numpy as jnp
from jax import lax
from jax.experimental import pallas as pl
from jax.experimental.pallas import tpu as pltpu

IN_FEATURES = 30
LAYER_DIMS = [(30, 16), (16, 8), (8, 4), (4, 1)]  # (fan_in, fan_out)


def _sigmoid_fast(z):
    # Exact identity sigmoid(z) == 0.5 * (1 + tanh(z/2)); a single EUP tanh
    # instead of exp + divide.  Differences vs jax.nn.sigmoid are O(1e-7).
    return 0.5 * (1.0 + jnp.tanh(0.5 * z))


def mlp_kernel(x_ref, w1_ref, b1_ref, w2_ref, b2_ref,
               w3_ref, b3_ref, w4_ref, b4_ref, o_ref):
    # x_ref: (TILE_B, 30) -- batch in sublanes, exactly as stored in HBM.
    x = x_ref[...]
    # Layer 1: contract the shared feature axis (last of both operands):
    #   (16, 30) . (TILE_B, 30) -> (16, TILE_B)
    # This lands the batch in the lane dimension with no wrapper transpose.
    h = lax.dot_general(w1_ref[...], x, (((1,), (1,)), ((), ())),
                        preferred_element_type=jnp.float32)
    h = _sigmoid_fast(h + b1_ref[...])
    # Layer 2: (8,16) @ (16,TB) -> (8,TB)
    h = jnp.dot(w2_ref[...], h, preferred_element_type=jnp.float32)
    h = _sigmoid_fast(h + b2_ref[...])
    # Layer 3: (4,8) @ (8,TB) -> (4,TB)
    h = jnp.dot(w3_ref[...], h, preferred_element_type=jnp.float32)
    h = _sigmoid_fast(h + b3_ref[...])
    # Layer 4: K=4, N=1 contraction on the VPU + sublane reduce (MXU idle).
    h = jnp.sum(w4_ref[...] * h, axis=0, keepdims=True) + b4_ref[...]  # (1,TB)
    # Exact sigmoid on the output layer; lane-dense (1, TILE_B) store.
    o_ref[...] = jax.nn.sigmoid(h).astype(o_ref.dtype)


def _round_up(n, m):
    return ((n + m - 1) // m) * m


def mlp_forward(x, params, *, tile_b=32768):
    """x: (B, 30), float32 or bfloat16. params: w_i (out, in) f32, b_i (out, 1) f32.

    Returns (B, 1) float32.  Weights are cast to x.dtype (pass bf16 x for the
    bf16 streaming path); biases / accumulation / output stay float32.
    """
    B, F = x.shape
    assert F == IN_FEATURES, (B, F)
    cdtype = x.dtype

    # Tile selection: a 128-multiple tile when tiling; if the whole batch fits
    # in one block, use it directly (block dim == full array dim is always a
    # legal block shape, so no padding is ever needed).
    tile_b = max(128, _round_up(int(tile_b), 128))
    if B <= tile_b:
        tile = B
        grid_b = 1
    else:
        tile = tile_b
        grid_b = pl.cdiv(B, tile)          # partial last block if non-dividing
    out_cols = grid_b * tile               # output tiles exactly; slice later

    w1 = params["w1"].astype(cdtype)
    w2 = params["w2"].astype(cdtype)
    w3 = params["w3"].astype(cdtype)
    w4 = params["w4"].T.astype(cdtype)      # (1,4) -> (4,1) for the VPU path
    b1 = params["b1"].astype(jnp.float32)
    b2 = params["b2"].astype(jnp.float32)
    b3 = params["b3"].astype(jnp.float32)
    b4 = params["b4"].astype(jnp.float32)

    weight_args = (w1, b1, w2, b2, w3, b3, w4, b4)
    # Full-array blocks, constant index_map -> weights stay resident in VMEM.
    weight_specs = [pl.BlockSpec(w.shape, lambda i: (0, 0)) for w in weight_args]

    flops = 2 * B * sum(fi * fo for fi, fo in LAYER_DIMS)
    transcendentals = B * sum(fo for _, fo in LAYER_DIMS)
    bytes_accessed = (x.size * x.dtype.itemsize + 4 * out_cols
                      + sum(w.size * w.dtype.itemsize for w in weight_args))
    cost = pl.CostEstimate(flops=flops, transcendentals=transcendentals,
                           bytes_accessed=bytes_accessed)

    out_t = pl.pallas_call(
        mlp_kernel,
        out_shape=jax.ShapeDtypeStruct((1, out_cols), jnp.float32),
        grid=(grid_b,),
        in_specs=[pl.BlockSpec((tile, F), lambda i: (i, 0))] + weight_specs,
        out_specs=pl.BlockSpec((1, tile), lambda i: (0, i)),
        compiler_params=pltpu.CompilerParams(
            dimension_semantics=("parallel",),
            vmem_limit_bytes=32 * 1024 * 1024,
        ),
        cost_estimate=cost,
    )(x, *weight_args)

    # Drop garbage columns from the partial last block; (B, 1) like torch.
    return out_t[:, :B].T


def init_params(key):
    """torch.nn.Linear-style U(-1/sqrt(fan_in), 1/sqrt(fan_in)) init,
       weights stored as (out_features, in_features), biases as (out, 1)."""
    params = {}
    for i, (fin, fout) in enumerate(LAYER_DIMS, start=1):
        key, kw, kb = jax.random.split(key, 3)
        bound = 1.0 / jnp.sqrt(fin)
        params[f"w{i}"] = jax.random.uniform(
            kw, (fout, fin), jnp.float32, minval=-bound, maxval=bound)
        params[f"b{i}"] = jax.random.uniform(
            kb, (fout, 1), jnp.float32, minval=-bound, maxval=bound)
    return params


def reference_forward(x, params):
    h = x
    for i in range(1, 5):
        h = jax.nn.sigmoid(h @ params[f"w{i}"].T + params[f"b{i}"].T)
    return h


if __name__ == "__main__":
    key = jax.random.PRNGKey(0)
    key_x, key_p = jax.random.split(key)
    params = init_params(key_p)

    # Case 1: tiny batch -> single full block, no padding anywhere.
    B = 8
    x = jax.random.normal(key_x, (B, 30), dtype=jnp.float32)
    out = jax.block_until_ready(mlp_forward(x, params))
    ref = reference_forward(x, params)
    assert out.shape == (B, 1), out.shape
    assert jnp.allclose(out, ref, atol=1e-5, rtol=1e-5), (out, ref)

    # Case 2: multi-block grid with a partial last block (no wrapper pad).
    B2 = 300
    x2 = jax.random.normal(key_x, (B2, 30), dtype=jnp.float32)
    out2 = jax.block_until_ready(mlp_forward(x2, params, tile_b=128))
    ref2 = reference_forward(x2, params)
    assert out2.shape == (B2, 1), out2.shape
    assert jnp.allclose(out2, ref2, atol=1e-5, rtol=1e-5)

    # Case 3: bf16 x / weight stream, f32 accumulation (looser tolerance).
    out_bf16 = jax.block_until_ready(
        mlp_forward(x2.astype(jnp.bfloat16), params, tile_b=128))
    assert out_bf16.shape == (B2, 1), out_bf16.shape
    assert jnp.allclose(out_bf16, ref2, atol=2e-2, rtol=2e-2)

    print("KERNEL_OK")
</pallas_src>

<mosaic_0001>
module attributes {stable_mosaic.version = 11 : i64} {
  func.func @mlp_kernel(%arg0: i32, %arg1: memref<8x30xf32, #tpu.memory_space<vmem>>, %arg2: memref<16x30xf32, #tpu.memory_space<vmem>>, %arg3: memref<16x1xf32, #tpu.memory_space<vmem>>, %arg4: memref<8x16xf32, #tpu.memory_space<vmem>>, %arg5: memref<8x1xf32, #tpu.memory_space<vmem>>, %arg6: memref<4x8xf32, #tpu.memory_space<vmem>>, %arg7: memref<4x1xf32, #tpu.memory_space<vmem>>, %arg8: memref<4x1xf32, #tpu.memory_space<vmem>>, %arg9: memref<1x1xf32, #tpu.memory_space<vmem>>, %arg10: memref<1x8xf32, #tpu.memory_space<vmem>>) attributes {dimension_semantics = [#tpu.dimension_semantics<parallel>], iteration_bounds = array<i64: 1>, scalar_prefetch = 0 : i64, scratch_operands = 0 : i64, tpu.core_type = #tpu.core_type<tc>, window_params = [{transform_indices = @transform_0, window_bounds = array<i64: 8, 30>}, {pipeline_mode = #tpu.pipeline_mode<synchronous>, transform_indices = @transform_1, window_bounds = array<i64: 16, 30>}, {pipeline_mode = #tpu.pipeline_mode<synchronous>, transform_indices = @transform_2, window_bounds = array<i64: 16, 1>}, {pipeline_mode = #tpu.pipeline_mode<synchronous>, transform_indices = @transform_3, window_bounds = array<i64: 8, 16>}, {pipeline_mode = #tpu.pipeline_mode<synchronous>, transform_indices = @transform_4, window_bounds = array<i64: 8, 1>}, {pipeline_mode = #tpu.pipeline_mode<synchronous>, transform_indices = @transform_5, window_bounds = array<i64: 4, 8>}, {pipeline_mode = #tpu.pipeline_mode<synchronous>, transform_indices = @transform_6, window_bounds = array<i64: 4, 1>}, {pipeline_mode = #tpu.pipeline_mode<synchronous>, transform_indices = @transform_7, window_bounds = array<i64: 4, 1>}, {pipeline_mode = #tpu.pipeline_mode<synchronous>, transform_indices = @transform_8, window_bounds = array<i64: 1, 1>}, {transform_indices = @transform_9, window_bounds = array<i64: 1, 8>}]} {
    %c0 = arith.constant 0 : index
    %c0_0 = arith.constant 0 : index
    %0 = vector.load %arg1[%c0, %c0_0] : memref<8x30xf32, #tpu.memory_space<vmem>>, vector<8x30xf32>
    %c0_1 = arith.constant 0 : index
    %c0_2 = arith.constant 0 : index
    %1 = vector.load %arg2[%c0_1, %c0_2] : memref<16x30xf32, #tpu.memory_space<vmem>>, vector<16x30xf32>
    %cst = arith.constant dense<0.000000e+00> : vector<16x8xf32>
    %2 = tpu.matmul %1, %0, %cst {dimension_numbers = #tpu.dot_dimension_numbers<[1], [1], [0], [0], [0, 0, 1, 0], [], []>} : vector<16x30xf32>, vector<8x30xf32>, vector<16x8xf32> -> vector<16x8xf32>
    %c0_3 = arith.constant 0 : index
    %c0_4 = arith.constant 0 : index
    %3 = vector.load %arg3[%c0_3, %c0_4] : memref<16x1xf32, #tpu.memory_space<vmem>>, vector<16x1xf32>
    %4 = vector.broadcast %3 : vector<16x1xf32> to vector<16x8xf32>
    %5 = arith.addf %2, %4 : vector<16x8xf32>
    %cst_5 = arith.constant 5.000000e-01 : f32
    %6 = vector.broadcast %cst_5 : f32 to vector<16x8xf32>
    %7 = arith.mulf %6, %5 : vector<16x8xf32>
    %8 = math.tanh %7 : vector<16x8xf32>
    %cst_6 = arith.constant 1.000000e+00 : f32
    %9 = vector.broadcast %cst_6 : f32 to vector<16x8xf32>
    %10 = arith.addf %9, %8 : vector<16x8xf32>
    %cst_7 = arith.constant 5.000000e-01 : f32
    %11 = vector.broadcast %cst_7 : f32 to vector<16x8xf32>
    %12 = arith.mulf %11, %10 : vector<16x8xf32>
    %c0_8 = arith.constant 0 : index
    %c0_9 = arith.constant 0 : index
    %13 = vector.load %arg4[%c0_8, %c0_9] : memref<8x16xf32, #tpu.memory_space<vmem>>, vector<8x16xf32>
    %cst_10 = arith.constant dense<0.000000e+00> : vector<8x8xf32>
    %14 = tpu.matmul %13, %12, %cst_10 {dimension_numbers = #tpu.dot_dimension_numbers<[1], [0], [0], [1], [0, 0, 1, 1], [], []>} : vector<8x16xf32>, vector<16x8xf32>, vector<8x8xf32> -> vector<8x8xf32>
    %c0_11 = arith.constant 0 : index
    %c0_12 = arith.constant 0 : index
    %15 = vector.load %arg5[%c0_11, %c0_12] : memref<8x1xf32, #tpu.memory_space<vmem>>, vector<8x1xf32>
    %16 = vector.broadcast %15 : vector<8x1xf32> to vector<8x8xf32>
    %17 = arith.addf %14, %16 : vector<8x8xf32>
    %cst_13 = arith.constant 5.000000e-01 : f32
    %18 = vector.broadcast %cst_13 : f32 to vector<8x8xf32>
    %19 = arith.mulf %18, %17 : vector<8x8xf32>
    %20 = math.tanh %19 : vector<8x8xf32>
    %cst_14 = arith.constant 1.000000e+00 : f32
    %21 = vector.broadcast %cst_14 : f32 to vector<8x8xf32>
    %22 = arith.addf %21, %20 : vector<8x8xf32>
    %cst_15 = arith.constant 5.000000e-01 : f32
    %23 = vector.broadcast %cst_15 : f32 to vector<8x8xf32>
    %24 = arith.mulf %23, %22 : vector<8x8xf32>
    %c0_16 = arith.constant 0 : index
    %c0_17 = arith.constant 0 : index
    %25 = vector.load %arg6[%c0_16, %c0_17] : memref<4x8xf32, #tpu.memory_space<vmem>>, vector<4x8xf32>
    %cst_18 = arith.constant dense<0.000000e+00> : vector<4x8xf32>
    %26 = tpu.matmul %25, %24, %cst_18 {dimension_numbers = #tpu.dot_dimension_numbers<[1], [0], [0], [1], [0, 0, 1, 1], [], []>} : vector<4x8xf32>, vector<8x8xf32>, vector<4x8xf32> -> vector<4x8xf32>
    %c0_19 = arith.constant 0 : index
    %c0_20 = arith.constant 0 : index
    %27 = vector.load %arg7[%c0_19, %c0_20] : memref<4x1xf32, #tpu.memory_space<vmem>>, vector<4x1xf32>
    %28 = vector.broadcast %27 : vector<4x1xf32> to vector<4x8xf32>
    %29 = arith.addf %26, %28 : vector<4x8xf32>
    %cst_21 = arith.constant 5.000000e-01 : f32
    %30 = vector.broadcast %cst_21 : f32 to vector<4x8xf32>
    %31 = arith.mulf %30, %29 : vector<4x8xf32>
    %32 = math.tanh %31 : vector<4x8xf32>
    %cst_22 = arith.constant 1.000000e+00 : f32
    %33 = vector.broadcast %cst_22 : f32 to vector<4x8xf32>
    %34 = arith.addf %33, %32 : vector<4x8xf32>
    %cst_23 = arith.constant 5.000000e-01 : f32
    %35 = vector.broadcast %cst_23 : f32 to vector<4x8xf32>
    %36 = arith.mulf %35, %34 : vector<4x8xf32>
    %c0_24 = arith.constant 0 : index
    %c0_25 = arith.constant 0 : index
    %37 = vector.load %arg8[%c0_24, %c0_25] : memref<4x1xf32, #tpu.memory_space<vmem>>, vector<4x1xf32>
    %38 = vector.broadcast %37 : vector<4x1xf32> to vector<4x8xf32>
    %39 = arith.mulf %38, %36 : vector<4x8xf32>
    %cst_26 = arith.constant dense<0.000000e+00> : vector<8xf32>
    %40 = vector.multi_reduction <add>, %39, %cst_26 [0] : vector<4x8xf32> to vector<8xf32>
    %41 = vector.shape_cast %40 : vector<8xf32> to vector<1x8xf32>
    %c0_27 = arith.constant 0 : index
    %c0_28 = arith.constant 0 : index
    %42 = vector.load %arg9[%c0_27, %c0_28] : memref<1x1xf32, #tpu.memory_space<vmem>>, vector<1x1xf32>
    %43 = vector.broadcast %42 : vector<1x1xf32> to vector<1x8xf32>
    %44 = arith.addf %41, %43 : vector<1x8xf32>
    %45 = arith.negf %44 : vector<1x8xf32>
    %46 = math.exp %45 : vector<1x8xf32>
    %cst_29 = arith.constant 1.000000e+00 : f32
    %47 = vector.broadcast %cst_29 : f32 to vector<1x8xf32>
    %48 = arith.addf %47, %46 : vector<1x8xf32>
    %49 = arith.divf %47, %48 : vector<1x8xf32>
    %c0_30 = arith.constant 0 : index
    %c0_31 = arith.constant 0 : index
    %50 = vector.load %arg10[%c0_30, %c0_31] : memref<1x8xf32, #tpu.memory_space<vmem>>, vector<1x8xf32>
    tpu.vector_store %arg10[%c0_30, %c0_31], %49 {strides = array<i32>} : memref<1x8xf32, #tpu.memory_space<vmem>>, vector<1x8xf32>,
    return
  }
  func.func @transform_0(%arg0: i32) -> (i32, i32) {
    %c0_i32 = arith.constant 0 : i32
    %c0_i32_0 = arith.constant 0 : i32
    return %arg0, %c0_i32 : i32, i32
  }
  func.func @transform_1(%arg0: i32) -> (i32, i32) {
    %c0_i32 = arith.constant 0 : i32
    %c0_i32_0 = arith.constant 0 : i32
    %c0_i32_1 = arith.constant 0 : i32
    return %c0_i32, %c0_i32_0 : i32, i32
  }
  func.func @transform_2(%arg0: i32) -> (i32, i32) {
    %c0_i32 = arith.constant 0 : i32
    %c0_i32_0 = arith.constant 0 : i32
    %c0_i32_1 = arith.constant 0 : i32
    return %c0_i32, %c0_i32_0 : i32, i32
  }
  func.func @transform_3(%arg0: i32) -> (i32, i32) {
    %c0_i32 = arith.constant 0 : i32
    %c0_i32_0 = arith.constant 0 : i32
    %c0_i32_1 = arith.constant 0 : i32
    return %c0_i32, %c0_i32_0 : i32, i32
  }
  func.func @transform_4(%arg0: i32) -> (i32, i32) {
    %c0_i32 = arith.constant 0 : i32
    %c0_i32_0 = arith.constant 0 : i32
    %c0_i32_1 = arith.constant 0 : i32
    return %c0_i32, %c0_i32_0 : i32, i32
  }
  func.func @transform_5(%arg0: i32) -> (i32, i32) {
    %c0_i32 = arith.constant 0 : i32
    %c0_i32_0 = arith.constant 0 : i32
    %c0_i32_1 = arith.constant 0 : i32
    return %c0_i32, %c0_i32_0 : i32, i32
  }
  func.func @transform_6(%arg0: i32) -> (i32, i32) {
    %c0_i32 = arith.constant 0 : i32
    %c0_i32_0 = arith.constant 0 : i32
    %c0_i32_1 = arith.constant 0 : i32
    return %c0_i32, %c0_i32_0 : i32, i32
  }
  func.func @transform_7(%arg0: i32) -> (i32, i32) {
    %c0_i32 = arith.constant 0 : i32
    %c0_i32_0 = arith.constant 0 : i32
    %c0_i32_1 = arith.constant 0 : i32
    return %c0_i32, %c0_i32_0 : i32, i32
  }
  func.func @transform_8(%arg0: i32) -> (i32, i32) {
    %c0_i32 = arith.constant 0 : i32
    %c0_i32_0 = arith.constant 0 : i32
    %c0_i32_1 = arith.constant 0 : i32
    return %c0_i32, %c0_i32_0 : i32, i32
  }
  func.func @transform_9(%arg0: i32) -> (i32, i32) {
    %c0_i32 = arith.constant 0 : i32
    %c0_i32_0 = arith.constant 0 : i32
    return %c0_i32, %arg0 : i32, i32
  }
}

</mosaic_0001>

<bundles_post_ra>
// kernel: tpu_custom_call.1
= control target key start
LH: loop header
LB: loop body
LE: loop exit
PB: predicated region body
PF: predicated region fallthrough
CT: control target
= control target key end

     0   :  { %s359_s0 = inlined_call_operand.vmem [shape: f32[8,30], index: 0, kind: input, shape index: {}]   ;;  %s360_s1 = inlined_call_operand.vmem [shape: f32[16,30], index: 1, kind: input, shape index: {}]   ;;  %s361_s2 = inlined_call_operand.vmem [shape: f32[16,1], index: 2, kind: input, shape index: {}]   ;;  %s362_s3 = inlined_call_operand.vmem [shape: f32[8,16], index: 3, kind: input, shape index: {}]   ;;  %s363_s4 = inlined_call_operand.vmem [shape: f32[8,1], index: 4, kind: input, shape index: {}]   ;;  %s364_s5 = inlined_call_operand.vmem [shape: f32[4,8], index: 5, kind: input, shape index: {}]   ;;  %s365_s6 = inlined_call_operand.vmem [shape: f32[4,1], index: 6, kind: input, shape index: {}]   ;;  %s366_s7 = inlined_call_operand.vmem [shape: f32[4,1], index: 7, kind: input, shape index: {}]   ;;  %s367_s8 = inlined_call_operand.<no memory space> [shape: f32[1,1], index: 8, kind: input, shape index: {}]   ;;  %s368_s9 = inlined_call_operand.hbm [shape: f32[1,8], index: 9, kind: output, shape index: {}]  }
   0x1   :  { %v14_v0 = vstv %s367_s8 }
   0x2   :  { %15 = vst [vmem:[#allocation2] sm:$0x1] %v14_v0 }
   0x3   :  { %v35_v1 = vld [vmem:[%s359_s0] sm:$0xff]  ;;  %vm50_vm0 = vcmask 244736   ;;  %v37_v3 = vld [vmem:[%s360_s1 + $0x8] sm:$0xff] }
   0x4   :  { %v36_v2 = vld [vmem:[%s360_s1] sm:$0xff]  ;;  %221 = vmatpush.xpose.msk.msra.mxu0 %vm50_vm0, %v35_v1  ;;  %227 = vmatpush.xpose.msk.msra.mxu3 %vm50_vm0, %v35_v1  ;;  %v39_v4 = vld [vmem:[%s361_s2 + $0x8] sm:$0xff] }
   0x5   :  { %16 = vsyncpa [#allocation4], 0  ;;  %v271_v5 = vmov 0   ;;  %v38_v6 = vld [vmem:[%s361_s2] sm:$0xff]  ;;  %vm98_vm1 = vcmask 130048   ;;  %vm133_vm2 = vcmask 64512  }
   0x6   :  { %230 = vset.pattern.permute.xlu0 %v271_v5  ;;  %231 = vset.pattern.permute.xlu1 %v271_v5  ;;  %v92_v8 = vld [vmem:[%s363_s4] sm:$0xff]  ;;  %vm168_vm3 = vcmask 60416   ;;  %s212_s26 = sshll.u32 %s368_s9, 4  ;;  %vm203_vm7 = vcmask 57344   ;;  %s213_s26 = int_to_ptr.hbm [resolvable:$true] %s212_s26 }
   0x7   :  { %47 = vperm.xlu0 %230, %v39_v4   ;;  %232 = vset.pattern.permute.xlu2 %v271_v5  ;;  %v127_v10 = vld [vmem:[%s365_s6] sm:$0xf] }
   0x8   :  { %222 = vmatmul.msk.f32.vlgmr.msra.gmra.mxu0 %vm50_vm0, %v36_v2  ;;  %223 = vmatmul.msk.f32.vlgmr.msra.gmra.mxu3 %vm50_vm0, %v37_v3  ;;  %v91_v23 = vld [vmem:[%s362_s3] sm:$0xff] }
   0x9   :  { %95 = vperm.xlu1 %231, %v92_v8   ;;  %v161_v24 = vld [vmem:[%s366_s7] sm:$0xf] }
   0xa   :  { %164 = vperm.xlu2 %232, %v161_v24   ;;  %v176_v25 = vld [vmem:[#allocation2] sm:$0x1] }
   0xb   :  { %v126_v33 = vld [vmem:[%s364_s5] sm:$0xf]  ;;  %s272_s5 = smov [#allocation3]  }
   0xc   :  { %s210_s7 = sshll.u32 %s272_s5, 4  ;;  %s211_s7 = int_to_ptr.vmem [resolvable:$true] %s210_s7 }
   0xf   :  { %42 = vperm.xlu0 %230, %v38_v6  }
  0x11   :  { %130 = vperm.xlu1 %231, %v127_v10  }
  0x12   :  { %179 = vperm.xlu2 %232, %v176_v25  }
  0x64   :  { %v165_v41 = vpop.permute.xlu2 %164 }
  0x6c   :  { %v180_v48 = vpop.permute.xlu2 %179 }
  0x6d   :  { %v182_v51 = vperm.slane %v180_v48, 0 }
  0x79   :  { %v48_v7 = vpop.permute.xlu0 %47 }
  0x7b   :  { %v96_v26 = vpop.permute.xlu1 %95 }
  0x81   :  { %v43_v9 = vpop.permute.xlu0 %42 }
  0x83   :  { %v131_v34 = vpop.permute.xlu1 %130 }
  0x85   :  { %v77_v11 = vpop.f32.mrf.mxu0 }
  0x86   :  { %v78_v12 = vadd.f32 %v77_v11, %v43_v9 }
  0x88   :  { %v83_v13 = vmul.f32 0.5, %v78_v12 }
  0x8a   :  { %233 = vtanh.f32 %v83_v13 }
  0x8b   :  { %v80_v14 = vpop.f32.mrf.mxu3 }
  0x8c   :  { %v81_v15 = vadd.f32 %v80_v14, %v48_v7 }
  0x8e   :  { %v84_v16 = vmul.f32 0.5, %v81_v15 }
  0x90   :  { %235 = vtanh.f32 %v84_v16  ;;  %v234_v17 = vpop.eup %233 }
  0x91   :  { %v87_v20 = vadd.f32 1.0, %v234_v17 }
  0x93   :  { %v89_v22 = vmul.f32 0.5, %v87_v20 }
  0x96   :  { %v236_v18 = vpop.eup %235 }
  0x97   :  { %v88_v19 = vadd.f32 1.0, %v236_v18 }
  0x99   :  { %v90_v21 = vmul.f32 0.5, %v88_v19 }
  0x9b   :  { %116 = vmatpush.msra.mxu1 %v90_v21 }
  0x9d   :  { %117 = vmatpush.msra.mxu1 %v89_v22 }
  0x9e   :  { %224 = vmatmul.msk.f32.vlgmr.msra.gmra.mxu1 %vm98_vm1, %v91_v23 }
 0x11b   :  { %v119_v27 = vpop.f32.mrf.mxu1 }
 0x11c   :  { %v120_v28 = vadd.f32 %v119_v27, %v96_v26 }
 0x11e   :  { %v122_v29 = vmul.f32 0.5, %v120_v28 }
 0x120   :  { %237 = vtanh.f32 %v122_v29 }
 0x126   :  { %v238_v30 = vpop.eup %237 }
 0x127   :  { %v124_v31 = vadd.f32 1.0, %v238_v30 }
 0x129   :  { %v125_v32 = vmul.f32 0.5, %v124_v31 }
 0x12b   :  { %152 = vmatpush.msra.mxu2 %v125_v32 }
 0x12c   :  { %225 = vmatmul.msk.f32.vlgmr.msra.gmra.mxu2 %vm133_vm2, %v126_v33 }
 0x1af   :  { %v154_v35 = vpop.f32.mrf.mxu2 }
 0x1b0   :  { %v155_v36 = vadd.f32 %v154_v35, %v131_v34 }
 0x1b2   :  { %v157_v37 = vmul.f32 0.5, %v155_v36 }
 0x1b4   :  { %239 = vtanh.f32 %v157_v37 }
 0x1ba   :  { %v240_v38 = vpop.eup %239 }
 0x1bb   :  { %v159_v39 = vadd.f32 1.0, %v240_v38 }
 0x1bd   :  { %v160_v40 = vmul.f32 0.5, %v159_v39 }
 0x1bf   :  { %v167_v42 = vmul.f32 %v165_v41, %v160_v40 }
 0x1c1   :  { %v169_v43 = vsel %vm168_vm3, %v167_v42, 0.0 }
 0x1c2   :  { %v170_v44 = vrot.slane %v169_v43, 4 }
 0x1c4   :  { %v171_v45 = vadd.f32 %v170_v44, %v169_v43 }
 0x1c6   :  { %v172_v46 = vrot.slane %v171_v45, 2 }
 0x1c8   :  { %v173_v47 = vadd.f32 %v172_v46, %v171_v45 }
 0x1ca   :  { %v174_v49 = vrot.slane %v173_v47, 1 }
 0x1cc   :  { %v175_v50 = vadd.f32 %v174_v49, %v173_v47 }
 0x1ce   :  { %v183_v52 = vadd.f32 %v182_v51, %v175_v50 }
 0x1d0   :  { %v226_v53 = vmul.f32 -1.442695, %v183_v52 }
 0x1d2   :  { %241 = vpow2.f32 %v226_v53 }
 0x1d8   :  { %v242_v54 = vpop.eup %241 }
 0x1d9   :  { %v187_v55 = vadd.f32 1.0, %v242_v54 }
 0x1db   :  { %243 = vrcp.f32 %v187_v55  ;;  %v199_v59 = vand.u32 2147483648, %v187_v55  ;;  %v197_v61 = vand.u32 2147483647, %v187_v55  ;;  %vm193_vm5 = vweird.f32 %v187_v55 }
 0x1dd   :  { %v200_v63 = vor.u32 1.1754944e-38, %v199_v59  ;;  %vm198_vm8 = vcmp.eq.f32.partialorder %v197_v61, 8.507059e+37 }
 0x1e1   :  { %v244_v56 = vpop.eup %243 }
 0x1e2   :  { %v189_v57 = vmul.f32 %v244_v56, %v187_v55  ;;  %vm194_vm4 = vweird.f32 %v244_v56 }
 0x1e3   :  { %vm195_vm6 = vmor %vm193_vm5, %vm194_vm4 }
 0x1e4   :  { %v190_v58 = vsub.f32 1.0, %v189_v57 }
 0x1e6   :  { %v191_v60 = vmul.f32 %v244_v56, %v190_v58 }
 0x1e8   :  { %v192_v62 = vadd.f32 %v244_v56, %v191_v60 }
 0x1ea   :  { %v196_v0 = vsel %vm195_vm6, %v244_v56, %v192_v62 }
 0x1eb   :  { %v201_v1 = vsel %vm198_vm8, %v200_v63, %v196_v0 }
 0x1ec   :  { %204 = vst.msk [vmem:[#allocation3] sm:$0x1] %vm203_vm7, %v201_v1 }
 0x1ed   :  { %215 = dma.vmem_to_hbm [thread:$0]  %s211_s7, 16, %s213_s26, [#allocation4]  }
 0x1ee   :  { %269 = dma.done.wait [#allocation4], 16  }
 0x1ef   :  { %270 = vsyncadd [#allocation4], 4294967280 }
 0x1f0   :  { %220 = vsyncpa [#allocation4], 1 }

</bundles_post_ra>
